<compile_context>
chip_gen: v6e
topology: v6e:2x2x1
jax: 0.10.0
libtpu: 0.0.40
codegen_flags: <defaults>
</compile_context>

<pallas_src>
import math
import jax
import jax.numpy as jnp
from jax.experimental import pallas as pl
from jax.experimental.pallas import tpu as pltpu


def _round_up(v, m):
    return (v + m - 1) // m * m


def _pick_tile(total, candidates):
    """Largest candidate (all multiples of 128) that divides `total`."""
    for c in candidates:
        if c <= total and total % c == 0:
            return c
    return total


def _vmem_limit(footprint_bytes):
    # Right-sized request: footprint + slack, clamped to stay safe on v7x (64 MiB/TC).
    return int(min(48 << 20, max(16 << 20, footprint_bytes + (8 << 20))))


# ------------------- fused path (small graphs, single call) ------------------
def _fused_small_call(xp, wp, ap, bp, has_bias):
    n_pad, d_in_p = xp.shape
    d_out_p = wp.shape[1]
    adj_item = ap.dtype.itemsize

    def kernel(*refs):
        if has_bias:
            x_ref, w_ref, adj_ref, b_ref, out_ref, sup_ref = refs
        else:
            x_ref, w_ref, adj_ref, out_ref, sup_ref = refs
        # support = x @ W (bf16 MXU inputs, f32 accumulation), kept in VMEM scratch.
        sup_ref[...] = jnp.dot(
            x_ref[...], w_ref[...], preferred_element_type=jnp.float32
        ).astype(jnp.bfloat16)
        # output = adj @ support (+ bias); adj cast to bf16 per tile in-kernel.
        acc = jnp.dot(
            adj_ref[...].astype(jnp.bfloat16), sup_ref[...],
            preferred_element_type=jnp.float32,
        )
        if has_bias:
            acc = acc + b_ref[...].astype(jnp.float32)
        out_ref[...] = acc.astype(out_ref.dtype)

    in_specs = [
        pl.BlockSpec((n_pad, d_in_p), lambda i: (0, 0)),      # x resident
        pl.BlockSpec((d_in_p, d_out_p), lambda i: (0, 0)),    # W resident
        pl.BlockSpec((n_pad, n_pad), lambda i: (0, 0)),       # adj resident
    ]
    operands = [xp, wp, ap]
    if has_bias:
        in_specs.append(pl.BlockSpec((1, d_out_p), lambda i: (0, 0)))
        operands.append(bp)

    flops = 2 * n_pad * d_in_p * d_out_p + 2 * n_pad * n_pad * d_out_p
    bytes_accessed = (xp.size * 2 + wp.size * 2 + ap.size * adj_item
                      + n_pad * d_out_p * 4)
    footprint = 2 * (xp.size * 2 + wp.size * 2 + ap.size * adj_item
                     + n_pad * d_out_p * 4) + n_pad * d_out_p * 2

    return pl.pallas_call(
        kernel,
        out_shape=jax.ShapeDtypeStruct((n_pad, d_out_p), jnp.float32),
        grid=(1,),
        in_specs=in_specs,
        out_specs=pl.BlockSpec((n_pad, d_out_p), lambda i: (0, 0)),
        scratch_shapes=[pltpu.VMEM((n_pad, d_out_p), jnp.bfloat16)],
        compiler_params=pltpu.CompilerParams(
            dimension_semantics=("arbitrary",),
            vmem_limit_bytes=_vmem_limit(footprint),
        ),
        cost_estimate=pl.CostEstimate(
            flops=flops, transcendentals=0, bytes_accessed=bytes_accessed),
    )(*operands)


# ------------------------- stage 1: support = x @ W --------------------------
def _support_kernel(x_ref, w_ref, out_ref, acc_ref):
    k = pl.program_id(1)

    @pl.when(k == 0)
    def _():
        acc_ref[...] = jnp.zeros_like(acc_ref)

    acc_ref[...] += jnp.dot(
        x_ref[...], w_ref[...], preferred_element_type=jnp.float32
    )

    @pl.when(k == pl.num_programs(1) - 1)
    def _():
        out_ref[...] = acc_ref[...].astype(out_ref.dtype)


def _compute_support(xp, wp):
    n_pad, d_in_p = xp.shape
    d_out_p = wp.shape[1]
    tm = _pick_tile(n_pad, (512, 384, 256, 128))
    tk = _pick_tile(d_in_p, (1024, 512, 256, 128))

    footprint = (2 * (tm * tk * 2 + tk * d_out_p * 2 + tm * d_out_p * 2)
                 + tm * d_out_p * 4)
    cost = pl.CostEstimate(
        flops=2 * n_pad * d_in_p * d_out_p,
        transcendentals=0,
        bytes_accessed=xp.size * 2 + (n_pad // tm) * wp.size * 2
                       + n_pad * d_out_p * 2,
    )
    return pl.pallas_call(
        _support_kernel,
        out_shape=jax.ShapeDtypeStruct((n_pad, d_out_p), jnp.bfloat16),
        grid=(n_pad // tm, d_in_p // tk),
        in_specs=[
            pl.BlockSpec((tm, tk), lambda i, k: (i, k)),        # x tile
            pl.BlockSpec((tk, d_out_p), lambda i, k: (k, 0)),   # W K-slab
        ],
        out_specs=pl.BlockSpec((tm, d_out_p), lambda i, k: (i, 0)),
        scratch_shapes=[pltpu.VMEM((tm, d_out_p), jnp.float32)],
        compiler_params=pltpu.CompilerParams(
            dimension_semantics=("parallel", "arbitrary"),
            vmem_limit_bytes=_vmem_limit(footprint),
        ),
        cost_estimate=cost,
    )(xp, wp)


# --------------------- stage 2: out = adj @ support + b ----------------------
def _aggregate_call(ap, support, bp, has_bias):
    n_pad = ap.shape[0]
    d_out_p = support.shape[1]
    adj_item = ap.dtype.itemsize

    # Large 128-aligned adj tiles (up to 512x1024); both divide n_pad.
    tm = _pick_tile(n_pad, (512, 384, 256, 128))
    tk = _pick_tile(n_pad, (1024, 768, 512, 384, 256, 128))

    sup_bytes = support.size * 2                 # bf16
    adj_buf = 2 * tm * tk * adj_item             # double-buffered adj stream
    out_buf = 2 * tm * d_out_p * 4               # double-buffered f32 output
    # Make support fully VMEM-resident when it fits comfortably (v7x budget).
    resident = (2 * sup_bytes + adj_buf + out_buf + (2 << 20)) <= (40 << 20)

    def kernel(*refs):
        if has_bias:
            adj_ref, sup_ref, b_ref, out_ref = refs
        else:
            adj_ref, sup_ref, out_ref = refs
        k = pl.program_id(1)

        @pl.when(k == 0)
        def _():
            out_ref[...] = jnp.zeros_like(out_ref)

        if resident:
            start = pl.multiple_of(k * tk, 128)
            sup = sup_ref[pl.ds(start, tk), :]
        else:
            sup = sup_ref[...]

        # adj streamed in its original dtype; cast to bf16 right before the MXU.
        out_ref[...] += jnp.dot(
            adj_ref[...].astype(jnp.bfloat16), sup,
            preferred_element_type=jnp.float32,
        )

        if has_bias:
            @pl.when(k == pl.num_programs(1) - 1)
            def _():
                out_ref[...] += b_ref[...].astype(out_ref.dtype)

    if resident:
        sup_spec = pl.BlockSpec((n_pad, d_out_p), lambda i, k: (0, 0))
        sup_reads = 1
        sup_vmem = 2 * sup_bytes
    else:
        sup_spec = pl.BlockSpec((tk, d_out_p), lambda i, k: (k, 0))
        sup_reads = n_pad // tm
        sup_vmem = 2 * tk * d_out_p * 2

    in_specs = [pl.BlockSpec((tm, tk), lambda i, k: (i, k)), sup_spec]
    operands = [ap, support]
    if has_bias:
        in_specs.append(pl.BlockSpec((1, d_out_p), lambda i, k: (0, 0)))
        operands.append(bp)

    footprint = adj_buf + out_buf + sup_vmem + (1 << 20)
    cost = pl.CostEstimate(
        flops=2 * n_pad * n_pad * d_out_p,
        transcendentals=0,
        bytes_accessed=ap.size * adj_item + sup_reads * sup_bytes
                       + n_pad * d_out_p * 4,
    )
    return pl.pallas_call(
        kernel,
        out_shape=jax.ShapeDtypeStruct((n_pad, d_out_p), jnp.float32),
        grid=(n_pad // tm, n_pad // tk),       # rows parallel, K reduction last
        in_specs=in_specs,
        out_specs=pl.BlockSpec((tm, d_out_p), lambda i, k: (i, 0)),
        compiler_params=pltpu.CompilerParams(
            dimension_semantics=("parallel", "arbitrary"),
            vmem_limit_bytes=_vmem_limit(footprint),
        ),
        cost_estimate=cost,
    )(*operands)


# ---------------------------------- wrapper ----------------------------------
def graph_convolution(x, adj, weight, bias=None, out_dtype=jnp.float32):
    """Pallas GCN layer forward.  x:(N,Din) adj:(N,N) weight:(Din,Dout)."""
    N, d_in = x.shape
    d_out = weight.shape[1]

    d_in_p = _round_up(d_in, 128)
    d_out_p = _round_up(d_out, 128)
    n_pad = _round_up(N, 128)          # pad to 128 only (no 512 rounding)

    # Dropout is identity in eval mode.
    # TODO(synk): training-mode stochastic dropout mask not implemented.

    xp = x
    if (n_pad, d_in_p) != (N, d_in):
        xp = jnp.pad(xp, ((0, n_pad - N), (0, d_in_p - d_in)))
    xp = xp.astype(jnp.bfloat16)

    wp = weight
    if (d_in_p, d_out_p) != (d_in, d_out):
        wp = jnp.pad(wp, ((0, d_in_p - d_in), (0, d_out_p - d_out)))
    wp = wp.astype(jnp.bfloat16)

    # adj: pad only when needed, keep original dtype (no wrapper-side O(N^2)
    # cast pass); the kernel casts each tile to bf16 before the MXU dot.
    ap = adj if n_pad == N else jnp.pad(adj, ((0, n_pad - N), (0, n_pad - N)))

    has_bias = bias is not None
    bp = None
    if has_bias:
        bp = jnp.pad(
            bias.reshape(1, d_out).astype(jnp.float32),
            ((0, 0), (0, d_out_p - d_out)),
        )

    fused_bytes = ((n_pad * d_in_p + d_in_p * d_out_p) * 2
                   + n_pad * n_pad * ap.dtype.itemsize
                   + n_pad * d_out_p * (4 + 2))
    if n_pad <= 512 and fused_bytes <= (24 << 20):
        out_p = _fused_small_call(xp, wp, ap, bp, has_bias)
    else:
        support = _compute_support(xp, wp)             # (n_pad, d_out_p) bf16
        out_p = _aggregate_call(ap, support, bp, has_bias)

    return out_p[:N, :d_out].astype(out_dtype)


def xavier_uniform(key, shape, dtype=jnp.float32):
    fan_in, fan_out = shape
    bound = math.sqrt(6.0 / (fan_in + fan_out))
    return jax.random.uniform(key, shape, dtype=dtype, minval=-bound, maxval=bound)


def _make_adj(key, n):
    a = (jax.random.uniform(key, (n, n)) > 0.7).astype(jnp.float32)
    a = jnp.maximum(a, a.T) + jnp.eye(n, dtype=jnp.float32)
    return a / jnp.sum(a, axis=1, keepdims=True)


if __name__ == "__main__":
    key = jax.random.PRNGKey(0)
    k_x, k_adj, k_w, k_b, k_x2, k_adj2, k_w2 = jax.random.split(key, 7)

    # --- small-graph (fused) path, shapes consistent with the module ---
    N, input_dim, output_dim = 16, 32, 64
    x = jax.random.normal(k_x, (N, input_dim), dtype=jnp.float32)
    a = _make_adj(k_adj, N)
    weight = xavier_uniform(k_w, (input_dim, output_dim))   # nn.init.xavier_uniform_
    bias = 0.1 * jax.random.normal(k_b, (output_dim,), dtype=jnp.float32)

    out = jax.block_until_ready(graph_convolution(x, a, weight, None))
    ref = a @ (x @ weight)
    assert out.shape == (N, output_dim)
    assert jnp.allclose(out, ref, atol=5e-2, rtol=5e-2), "mismatch (small, no bias)"

    out_b = jax.block_until_ready(graph_convolution(x, a, weight, bias))
    assert out_b.shape == (N, output_dim)
    assert jnp.allclose(out_b, ref + bias[None, :], atol=5e-2, rtol=5e-2), \
        "mismatch (small, bias)"

    # --- larger graph exercising the two-stage tiled path ---
    N2, din2, dout2 = 640, 96, 80
    x2 = jax.random.normal(k_x2, (N2, din2), dtype=jnp.float32)
    a2 = _make_adj(k_adj2, N2)
    w2 = xavier_uniform(k_w2, (din2, dout2))

    out2 = jax.block_until_ready(graph_convolution(x2, a2, w2, None))
    ref2 = a2 @ (x2 @ w2)
    assert out2.shape == (N2, dout2)
    assert jnp.allclose(out2, ref2, atol=5e-2, rtol=5e-2), "mismatch (large, no bias)"

    print("KERNEL_OK")
</pallas_src>

<mosaic_0001>
module attributes {stable_mosaic.version = 11 : i64} {
  func.func @kernel(%arg0: i32, %arg1: memref<128x128xbf16, #tpu.memory_space<vmem>>, %arg2: memref<128x128xbf16, #tpu.memory_space<vmem>>, %arg3: memref<128x128xf32, #tpu.memory_space<vmem>>, %arg4: memref<128x128xf32, #tpu.memory_space<vmem>>, %arg5: memref<128x128xbf16, #tpu.memory_space<vmem>>) attributes {dimension_semantics = [#tpu.dimension_semantics<arbitrary>], iteration_bounds = array<i64: 1>, scalar_prefetch = 0 : i64, scratch_operands = 1 : i64, tpu.core_type = #tpu.core_type<tc>, window_params = [{pipeline_mode = #tpu.pipeline_mode<synchronous>, transform_indices = @transform_0, window_bounds = array<i64: 128, 128>}, {pipeline_mode = #tpu.pipeline_mode<synchronous>, transform_indices = @transform_1, window_bounds = array<i64: 128, 128>}, {pipeline_mode = #tpu.pipeline_mode<synchronous>, transform_indices = @transform_2, window_bounds = array<i64: 128, 128>}, {pipeline_mode = #tpu.pipeline_mode<synchronous>, transform_indices = @transform_3, window_bounds = array<i64: 128, 128>}]} {
    %c0 = arith.constant 0 : index
    %c0_0 = arith.constant 0 : index
    %0 = vector.load %arg1[%c0, %c0_0] : memref<128x128xbf16, #tpu.memory_space<vmem>>, vector<128x128xbf16>
    %c0_1 = arith.constant 0 : index
    %c0_2 = arith.constant 0 : index
    %1 = vector.load %arg2[%c0_1, %c0_2] : memref<128x128xbf16, #tpu.memory_space<vmem>>, vector<128x128xbf16>
    %cst = arith.constant dense<0.000000e+00> : vector<128x128xf32>
    %2 = tpu.matmul %0, %1, %cst {dimension_numbers = #tpu.dot_dimension_numbers<[1], [0], [0], [1], [0, 0, 1, 1], [], []>} : vector<128x128xbf16>, vector<128x128xbf16>, vector<128x128xf32> -> vector<128x128xf32>
    %3 = arith.truncf %2 : vector<128x128xf32> to vector<128x128xbf16>
    %c0_3 = arith.constant 0 : index
    %c0_4 = arith.constant 0 : index
    %4 = vector.load %arg5[%c0_3, %c0_4] : memref<128x128xbf16, #tpu.memory_space<vmem>>, vector<128x128xbf16>
    tpu.vector_store %arg5[%c0_3, %c0_4], %3 {strides = array<i32>} : memref<128x128xbf16, #tpu.memory_space<vmem>>, vector<128x128xbf16>,
    %c0_5 = arith.constant 0 : index
    %c0_6 = arith.constant 0 : index
    %5 = vector.load %arg3[%c0_5, %c0_6] : memref<128x128xf32, #tpu.memory_space<vmem>>, vector<128x128xf32>
    %6 = arith.truncf %5 : vector<128x128xf32> to vector<128x128xbf16>
    %c0_7 = arith.constant 0 : index
    %c0_8 = arith.constant 0 : index
    %7 = vector.load %arg5[%c0_7, %c0_8] : memref<128x128xbf16, #tpu.memory_space<vmem>>, vector<128x128xbf16>
    %cst_9 = arith.constant dense<0.000000e+00> : vector<128x128xf32>
    %8 = tpu.matmul %6, %7, %cst_9 {dimension_numbers = #tpu.dot_dimension_numbers<[1], [0], [0], [1], [0, 0, 1, 1], [], []>} : vector<128x128xbf16>, vector<128x128xbf16>, vector<128x128xf32> -> vector<128x128xf32>
    %c0_10 = arith.constant 0 : index
    %c0_11 = arith.constant 0 : index
    %9 = vector.load %arg4[%c0_10, %c0_11] : memref<128x128xf32, #tpu.memory_space<vmem>>, vector<128x128xf32>
    tpu.vector_store %arg4[%c0_10, %c0_11], %8 {strides = array<i32>} : memref<128x128xf32, #tpu.memory_space<vmem>>, vector<128x128xf32>,
    return
  }
  func.func @transform_0(%arg0: i32) -> (i32, i32) {
    %c0_i32 = arith.constant 0 : i32
    %c0_i32_0 = arith.constant 0 : i32
    %c0_i32_1 = arith.constant 0 : i32
    return %c0_i32, %c0_i32_0 : i32, i32
  }
  func.func @transform_1(%arg0: i32) -> (i32, i32) {
    %c0_i32 = arith.constant 0 : i32
    %c0_i32_0 = arith.constant 0 : i32
    %c0_i32_1 = arith.constant 0 : i32
    return %c0_i32, %c0_i32_0 : i32, i32
  }
  func.func @transform_2(%arg0: i32) -> (i32, i32) {
    %c0_i32 = arith.constant 0 : i32
    %c0_i32_0 = arith.constant 0 : i32
    %c0_i32_1 = arith.constant 0 : i32
    return %c0_i32, %c0_i32_0 : i32, i32
  }
  func.func @transform_3(%arg0: i32) -> (i32, i32) {
    %c0_i32 = arith.constant 0 : i32
    %c0_i32_0 = arith.constant 0 : i32
    %c0_i32_1 = arith.constant 0 : i32
    return %c0_i32, %c0_i32_0 : i32, i32
  }
}

</mosaic_0001>

<bundles_post_ra>
// kernel: tpu_custom_call.1
= control target key start
LH: loop header
LB: loop body
LE: loop exit
PB: predicated region body
PF: predicated region fallthrough
CT: control target
= control target key end

     0   :  { %8 = vsyncpa [#allocation4], 0  ;;  %s944_s0 = inlined_call_operand.hbm [shape: bf16[128,128], index: 0, kind: input, shape index: {}]   ;;  %s945_s1 = inlined_call_operand.hbm [shape: bf16[128,128], index: 1, kind: input, shape index: {}]   ;;  %s946_s2 = inlined_call_operand.hbm [shape: f32[128,128], index: 2, kind: input, shape index: {}]   ;;  %s947_s3 = inlined_call_operand.hbm [shape: f32[128,128], index: 3, kind: output, shape index: {}]  }
   0x1   :  { %9 = vsyncpa [#allocation7], 0 }
   0x2   :  { %10 = vsyncpa [#allocation5], 0  ;;  %s898_s12 = smov [#allocation6]   ;;  %s899_s14 = smov [#allocation3]  }
   0x3   :  { %s28_s13 = sshll.u32 %s898_s12, 4  ;;  %s16_s15 = sshll.u32 %s899_s14, 4  ;;  %s29_s13 = int_to_ptr.vmem [resolvable:$true] %s28_s13  ;;  %s17_s15 = int_to_ptr.vmem [resolvable:$true] %s16_s15 }
   0x4   :  { %s820_s16 = scalar_lea.vmem %s29_s13, 1024  ;;  %p825_p1 = scmp.lt.s32.totalorder %s29_s13, %s29_s13 }
   0x5   :  { %p821_p0 = scmp.ne.s32.totalorder %s29_s13, %s820_s16  ;;  %p826_p2 = scmp.lt.s32.totalorder %s820_s16, %s820_s16 }
   0x7   :  { %p827_p3 = por %p826_p2, %p825_p1 }
   0x9   :  { %p828_p4 = pnand %p827_p3, %p821_p0 }
   0xb   :  { %831 = shalt.err (!%p828_p4)
}
   0xc   :  { %s900_s17 = smov 64   ;;  %s901_s18 = smov 4  }
   0xd   :  { %34 = dma.hbm_to_vmem [thread:$0]  %s945_s1, 1024, %s29_s13, [#allocation7], %s900_s17, %s900_s17, %s901_s18  }
   0xe   :  { %s840_s21 = scalar_lea.vmem %s17_s15, 1024  ;;  %p845_p6 = scmp.lt.s32.totalorder %s17_s15, %s17_s15 }
   0xf   :  { %p841_p5 = scmp.ne.s32.totalorder %s17_s15, %s840_s21  ;;  %p846_p7 = scmp.lt.s32.totalorder %s840_s21, %s840_s21 }
  0x11   :  { %p847_p8 = por %p846_p7, %p845_p6 }
  0x13   :  { %p848_p9 = pnand %p847_p8, %p841_p5 }
  0x15   :  { %851 = shalt.err (!%p848_p9)
}
  0x16   :  { %22 = dma.hbm_to_vmem [thread:$0]  %s944_s0, 1024, %s17_s15, [#allocation4], %s900_s17, %s900_s17, %s901_s18  }
  0x17   :  { %s902_s24 = smov [#allocation8]  }
  0x18   :  { %s40_s25 = sshll.u32 %s902_s24, 4  ;;  %s41_s25 = int_to_ptr.vmem [resolvable:$true] %s40_s25 }
  0x19   :  { %s860_s26 = scalar_lea.vmem %s41_s25, 2048  ;;  %p865_p11 = scmp.lt.s32.totalorder %s41_s25, %s41_s25 }
  0x1a   :  { %p861_p10 = scmp.ne.s32.totalorder %s41_s25, %s860_s26  ;;  %p866_p12 = scmp.lt.s32.totalorder %s860_s26, %s860_s26 }
  0x1c   :  { %p867_p13 = por %p866_p12, %p865_p11 }
  0x1e   :  { %p868_p0 = pnand %p867_p13, %p861_p10 }
  0x20   :  { %871 = shalt.err (!%p868_p0)
}
  0x21   :  { %s903_s1 = smov 128   ;;  %s904_s27 = smov 8  }
  0x22   :  { %46 = dma.hbm_to_vmem [thread:$0]  %s946_s2, 2048, %s41_s25, [#allocation7], %s903_s1, %s903_s1, %s904_s27  }
  0x23   :  { %892 = dma.done.wait [#allocation4], 1024  }
  0x24   :  { %893 = vsyncadd [#allocation4], 4294966272 }
  0x25   :  { %894 = dma.done.wait [#allocation7], 3072  }
  0x26   :  { %895 = vsyncadd [#allocation7], 4294964224  ;;  %v788_v0 = vld [vmem:[#allocation6 + $0x38] sm:$0xff]   ;;  %v789_v1 = vld [vmem:[#allocation6 + $0x30] sm:$0xff]   ;;  %s905_s0 = smov [#allocation9]  }
  0x27   :  { %716 = vmatprep.subr.bf16.mxu0 %v788_v0  ;;  %v790_v2 = vld [vmem:[#allocation6 + $0x28] sm:$0xff]   ;;  %v791_v3 = vld [vmem:[#allocation6 + $0x20] sm:$0xff]   ;;  %v792_v5 = vld [vmem:[#allocation6 + $0x18] sm:$0xff]   ;;  %s568_s2 = sshll.u32 %s905_s0, 4  ;;  %s569_s2 = int_to_ptr.vmem [resolvable:$true] %s568_s2 }
  0x28   :  { %717 = vmatpush3.bf16.msra.mxu0 %v788_v0  ;;  %v796_v4 = vld [vmem:[#allocation3] sm:$0xff]   ;;  %v793_v6 = vld [vmem:[#allocation6 + $0x10] sm:$0xff]   ;;  %v794_v7 = vld [vmem:[#allocation6 + $0x8] sm:$0xff]   ;;  %s872_s30 = scalar_lea.vmem %s569_s2, 2048  ;;  %p877_p2 = scmp.lt.s32.totalorder %s569_s2, %s569_s2 }
  0x29   :  { %718 = vmatprep.subr.bf16.mxu0 %v789_v1  ;;  %732 = vmatprep.mubr.bf16.mxu0 %v796_v4  ;;  %v795_v8 = vld [vmem:[#allocation6] sm:$0xff]   ;;  %v797_v9 = vld [vmem:[#allocation3 + $0x8] sm:$0xff]   ;;  %v798_v10 = vld [vmem:[#allocation3 + $0x10] sm:$0xff]   ;;  %p873_p1 = scmp.ne.s32.totalorder %s569_s2, %s872_s30  ;;  %p878_p3 = scmp.lt.s32.totalorder %s872_s30, %s872_s30 }
  0x2a   :  { %v799_v11 = vld [vmem:[#allocation3 + $0x18] sm:$0xff]   ;;  %v800_v12 = vld [vmem:[#allocation3 + $0x20] sm:$0xff]   ;;  %v801_v13 = vld [vmem:[#allocation3 + $0x28] sm:$0xff]  }
  0x2b   :  { %v802_v14 = vld [vmem:[#allocation3 + $0x30] sm:$0xff]   ;;  %v803_v15 = vld [vmem:[#allocation3 + $0x38] sm:$0xff]   ;;  %v362_v16 = vld [vmem:[#allocation8] sm:$0xff]  ;;  %p879_p4 = por %p878_p3, %p877_p2 }
  0x2c   :  { %719 = vmatpush3.bf16.msra.mxu0 %v789_v1  ;;  %v363_v17 = vld [vmem:[#allocation8 + $0x8] sm:$0xff]  ;;  %v364_v51 = vld [vmem:[#allocation8 + $0x10] sm:$0xff]  ;;  %v365_v52 = vld [vmem:[#allocation8 + $0x18] sm:$0xff] }
  0x2d   :  { %720 = vmatprep.subr.bf16.mxu0 %v790_v2  ;;  %v378_v18 = vpack.c.bf16 %v363_v17, %v362_v16  ;;  %v366_v53 = vld [vmem:[#allocation8 + $0x20] sm:$0xff]  ;;  %v367_v54 = vld [vmem:[#allocation8 + $0x28] sm:$0xff]  ;;  %v379_v55 = vpack.c.bf16 %v365_v52, %v364_v51  ;;  %v368_v57 = vld [vmem:[#allocation8 + $0x30] sm:$0xff]  ;;  %p880_p5 = pnand %p879_p4, %p873_p1 }
  0x2e   :  { %v380_v56 = vpack.c.bf16 %v367_v54, %v366_v53  ;;  %v369_v58 = vld [vmem:[#allocation8 + $0x38] sm:$0xff]  ;;  %v370_v59 = vld [vmem:[#allocation8 + $0x40] sm:$0xff]  ;;  %v371_v60 = vld [vmem:[#allocation8 + $0x48] sm:$0xff] }
  0x2f   :  { %764 = vmatprep.mubr.bf16.mxu1 %v378_v18  ;;  %v381_v61 = vpack.c.bf16 %v369_v58, %v368_v57  ;;  %v382_v62 = vpack.c.bf16 %v371_v60, %v370_v59  ;;  %v372_v63 = vld [vmem:[#allocation8 + $0x50] sm:$0xff]  ;;  %v373_v0 = vld [vmem:[#allocation8 + $0x58] sm:$0xff]  ;;  %v374_v1 = vld [vmem:[#allocation8 + $0x60] sm:$0xff] }
  0x30   :  { %721 = vmatpush3.bf16.msra.mxu0 %v790_v2  ;;  %v375_v2 = vld [vmem:[#allocation8 + $0x68] sm:$0xff] }
  0x31   :  { %722 = vmatprep.subr.bf16.mxu0 %v791_v3  ;;  %v384_v4 = vpack.c.bf16 %v375_v2, %v374_v1 }
  0x34   :  { %723 = vmatpush3.bf16.msra.mxu0 %v791_v3  ;;  %v383_v3 = vpack.c.bf16 %v373_v0, %v372_v63 }
  0x35   :  { %724 = vmatprep.subr.bf16.mxu0 %v792_v5 }
  0x38   :  { %725 = vmatpush3.bf16.msra.mxu0 %v792_v5  ;;  %v376_v5 = vld [vmem:[#allocation8 + $0x70] sm:$0xff] }
  0x39   :  { %726 = vmatprep.subr.bf16.mxu0 %v793_v6 }
  0x3c   :  { %727 = vmatpush3.bf16.msra.mxu0 %v793_v6  ;;  %v377_v6 = vld [vmem:[#allocation8 + $0x78] sm:$0xff] }
  0x3d   :  { %728 = vmatprep.subr.bf16.mxu0 %v794_v7 }
  0x40   :  { %729 = vmatpush3.bf16.msra.mxu0 %v794_v7  ;;  %v385_v7 = vpack.c.bf16 %v377_v6, %v376_v5 }
  0x41   :  { %730 = vmatprep.subr.bf16.mxu0 %v795_v8 }
  0x44   :  { %731 = vmatpush3.bf16.msra.mxu0 %v795_v8 }
  0x47   :  { %733 = vmatmul.mubr.bf16.vlgmr.msra.gmra.mxu0 %v797_v9 }
  0x48   :  { %736 = vmatprep.mubr.bf16.mxu0 %v798_v10 }
  0x4f   :  { %737 = vmatmul.mubr.bf16.gmra.mxu0 %v799_v11 }
  0x50   :  { %740 = vmatprep.mubr.bf16.mxu0 %v800_v12 }
  0x57   :  { %741 = vmatmul.mubr.bf16.gmra.mxu0 %v801_v13 }
  0x58   :  { %744 = vmatprep.mubr.bf16.mxu0 %v802_v14 }
  0x5f   :  { %745 = vmatmul.mubr.bf16.gmra.mxu0 %v803_v15 }
 0x107   :  { %v734_v19 = vpop.f32.mrf.mxu0 }
 0x109   :  { %v219_v20 = vpop.f32.mrf.mxu0 }
 0x10b   :  { %v735_v21 = vpop.f32.mrf.mxu0 }
 0x10c   :  { %v645_v22 = vpack.c.bf16 %v735_v21, %v734_v19 }
 0x10d   :  { %v222_v23 = vpop.f32.mrf.mxu0 }
 0x10e   :  { %677 = vst [vmem:[#allocation2 + $0x8] sm:$0xff] %v645_v22   ;;  %v640_v24 = vpack.c.bf16 %v222_v23, %v219_v20 }
 0x10f   :  { %v738_v25 = vpop.f32.mrf.mxu0 }
 0x110   :  { %641 = vst [vmem:[#allocation2] sm:$0xff] %v640_v24  }
 0x111   :  { %v235_v26 = vpop.f32.mrf.mxu0 }
 0x113   :  { %v739_v27 = vpop.f32.mrf.mxu0 }
 0x114   :  { %v655_v28 = vpack.c.bf16 %v739_v27, %v738_v25 }
 0x115   :  { %v238_v29 = vpop.f32.mrf.mxu0  ;;  %v810_v49 = vld [vmem:[#allocation2 + $0x8] sm:$0xff]  }
 0x116   :  { %679 = vst [vmem:[#allocation2 + $0x18] sm:$0xff] %v655_v28   ;;  %v650_v30 = vpack.c.bf16 %v238_v29, %v235_v26 }
 0x117   :  { %v742_v31 = vpop.f32.mrf.mxu0  ;;  %v811_v50 = vld [vmem:[#allocation2] sm:$0xff]  }
 0x118   :  { %678 = vst [vmem:[#allocation2 + $0x10] sm:$0xff] %v650_v30  }
 0x119   :  { %v251_v32 = vpop.f32.mrf.mxu0 }
 0x11b   :  { %v743_v33 = vpop.f32.mrf.mxu0 }
 0x11c   :  { %v665_v34 = vpack.c.bf16 %v743_v33, %v742_v31 }
 0x11d   :  { %v254_v35 = vpop.f32.mrf.mxu0  ;;  %v808_v47 = vld [vmem:[#allocation2 + $0x18] sm:$0xff]  }
 0x11e   :  { %681 = vst [vmem:[#allocation2 + $0x28] sm:$0xff] %v665_v34   ;;  %v660_v36 = vpack.c.bf16 %v254_v35, %v251_v32 }
 0x11f   :  { %v746_v37 = vpop.f32.mrf.mxu0  ;;  %v809_v48 = vld [vmem:[#allocation2 + $0x10] sm:$0xff]  }
 0x120   :  { %680 = vst [vmem:[#allocation2 + $0x20] sm:$0xff] %v660_v36  }
 0x121   :  { %v267_v38 = vpop.f32.mrf.mxu0 }
 0x123   :  { %v747_v39 = vpop.f32.mrf.mxu0 }
 0x124   :  { %v675_v40 = vpack.c.bf16 %v747_v39, %v746_v37 }
 0x125   :  { %v270_v41 = vpop.f32.mrf.mxu0  ;;  %v806_v45 = vld [vmem:[#allocation2 + $0x28] sm:$0xff]  }
 0x126   :  { %683 = vst [vmem:[#allocation2 + $0x38] sm:$0xff] %v675_v40   ;;  %v670_v42 = vpack.c.bf16 %v270_v41, %v267_v38 }
 0x127   :  { %v807_v46 = vld [vmem:[#allocation2 + $0x20] sm:$0xff]  }
 0x128   :  { %682 = vst [vmem:[#allocation2 + $0x30] sm:$0xff] %v670_v42  }
 0x12d   :  { %v804_v43 = vld [vmem:[#allocation2 + $0x38] sm:$0xff]  }
 0x12e   :  { %748 = vmatprep.subr.bf16.mxu1 %v804_v43 }
 0x12f   :  { %v805_v44 = vld [vmem:[#allocation2 + $0x30] sm:$0xff]   ;;  %749 = vmatpush3.bf16.msra.mxu1 %v804_v43 }
 0x130   :  { %750 = vmatprep.subr.bf16.mxu1 %v805_v44 }
 0x133   :  { %751 = vmatpush3.bf16.msra.mxu1 %v805_v44 }
 0x134   :  { %752 = vmatprep.subr.bf16.mxu1 %v806_v45 }
 0x137   :  { %753 = vmatpush3.bf16.msra.mxu1 %v806_v45 }
 0x138   :  { %754 = vmatprep.subr.bf16.mxu1 %v807_v46 }
 0x13b   :  { %755 = vmatpush3.bf16.msra.mxu1 %v807_v46 }
 0x13c   :  { %756 = vmatprep.subr.bf16.mxu1 %v808_v47 }
 0x13f   :  { %757 = vmatpush3.bf16.msra.mxu1 %v808_v47 }
 0x140   :  { %758 = vmatprep.subr.bf16.mxu1 %v809_v48 }
 0x143   :  { %759 = vmatpush3.bf16.msra.mxu1 %v809_v48 }
 0x144   :  { %760 = vmatprep.subr.bf16.mxu1 %v810_v49 }
 0x147   :  { %761 = vmatpush3.bf16.msra.mxu1 %v810_v49 }
 0x148   :  { %762 = vmatprep.subr.bf16.mxu1 %v811_v50 }
 0x14b   :  { %763 = vmatpush3.bf16.msra.mxu1 %v811_v50 }
 0x14e   :  { %765 = vmatmul.mubr.bf16.vlgmr.msra.gmra.mxu1 %v379_v55 }
 0x14f   :  { %768 = vmatprep.mubr.bf16.mxu1 %v380_v56 }
 0x156   :  { %769 = vmatmul.mubr.bf16.gmra.mxu1 %v381_v61 }
 0x157   :  { %772 = vmatprep.mubr.bf16.mxu1 %v382_v62 }
 0x15e   :  { %773 = vmatmul.mubr.bf16.gmra.mxu1 %v383_v3 }
 0x15f   :  { %776 = vmatprep.mubr.bf16.mxu1 %v384_v4 }
 0x166   :  { %777 = vmatmul.mubr.bf16.gmra.mxu1 %v385_v7 }
 0x20e   :  { %v766_v8 = vpop.f32.mrf.mxu1 }
 0x20f   :  { %549 = vst [vmem:[#allocation9 + $0x10] sm:$0xff] %v766_v8 }
 0x210   :  { %v484_v9 = vpop.f32.mrf.mxu1 }
 0x211   :  { %547 = vst [vmem:[#allocation9] sm:$0xff] %v484_v9 }
 0x212   :  { %v767_v10 = vpop.f32.mrf.mxu1 }
 0x213   :  { %550 = vst [vmem:[#allocation9 + $0x18] sm:$0xff] %v767_v10 }
 0x214   :  { %v487_v11 = vpop.f32.mrf.mxu1 }
 0x215   :  { %548 = vst [vmem:[#allocation9 + $0x8] sm:$0xff] %v487_v11 }
 0x216   :  { %v770_v12 = vpop.f32.mrf.mxu1 }
 0x217   :  { %553 = vst [vmem:[#allocation9 + $0x30] sm:$0xff] %v770_v12 }
 0x218   :  { %v500_v13 = vpop.f32.mrf.mxu1 }
 0x219   :  { %551 = vst [vmem:[#allocation9 + $0x20] sm:$0xff] %v500_v13 }
 0x21a   :  { %v771_v14 = vpop.f32.mrf.mxu1 }
 0x21b   :  { %554 = vst [vmem:[#allocation9 + $0x38] sm:$0xff] %v771_v14 }
 0x21c   :  { %v503_v15 = vpop.f32.mrf.mxu1 }
 0x21d   :  { %552 = vst [vmem:[#allocation9 + $0x28] sm:$0xff] %v503_v15 }
 0x21e   :  { %v774_v16 = vpop.f32.mrf.mxu1 }
 0x21f   :  { %557 = vst [vmem:[#allocation9 + $0x50] sm:$0xff] %v774_v16 }
 0x220   :  { %v516_v17 = vpop.f32.mrf.mxu1 }
 0x221   :  { %555 = vst [vmem:[#allocation9 + $0x40] sm:$0xff] %v516_v17 }
 0x222   :  { %v775_v18 = vpop.f32.mrf.mxu1 }
 0x223   :  { %558 = vst [vmem:[#allocation9 + $0x58] sm:$0xff] %v775_v18 }
 0x224   :  { %v519_v19 = vpop.f32.mrf.mxu1 }
 0x225   :  { %556 = vst [vmem:[#allocation9 + $0x48] sm:$0xff] %v519_v19 }
 0x226   :  { %v778_v20 = vpop.f32.mrf.mxu1 }
 0x227   :  { %561 = vst [vmem:[#allocation9 + $0x70] sm:$0xff] %v778_v20 }
 0x228   :  { %v532_v21 = vpop.f32.mrf.mxu1 }
 0x229   :  { %559 = vst [vmem:[#allocation9 + $0x60] sm:$0xff] %v532_v21 }
 0x22a   :  { %v779_v22 = vpop.f32.mrf.mxu1 }
 0x22b   :  { %562 = vst [vmem:[#allocation9 + $0x78] sm:$0xff] %v779_v22 }
 0x22c   :  { %v535_v23 = vpop.f32.mrf.mxu1 }
 0x22d   :  { %560 = vst [vmem:[#allocation9 + $0x68] sm:$0xff] %v535_v23 }
 0x22e   :  { %883 = shalt.err (!%p880_p5)
}
 0x22f   :  { %574 = dma.vmem_to_hbm [thread:$0]  %s569_s2, 2048, %s947_s3, [#allocation5], %s903_s1, %s903_s1, %s904_s27  }
 0x230   :  { %896 = dma.done.wait [#allocation5], 2048  }
 0x231   :  { %897 = vsyncadd [#allocation5], 4294965248 }
 0x232   :  { %578 = vsyncpa [#allocation4], 1 }
 0x233   :  { %579 = vsyncpa [#allocation7], 1 }
 0x234   :  { %580 = vsyncpa [#allocation5], 1 }

</bundles_post_ra>
